<compile_context>
chip_gen: v7x
topology: tpu7x:2x2x1
jax: 0.10.0
libtpu: 0.0.40
codegen_flags: <defaults>
</compile_context>

<pallas_src>
import math
import functools

import jax
import jax.numpy as jnp
from jax.experimental import pallas as pl
from jax.experimental.pallas import tpu as pltpu

COMPUTE_DTYPE = jnp.bfloat16          # MXU operand dtype (f32 accumulation everywhere)
LN_EPS = 1e-12


def _derive_vmem_limit():
    """Generation-aware VMEM budget (v5e/v6e: 128 MiB, v7x: 64 MiB physical)."""
    cap = None
    try:
        cap = getattr(pltpu.get_tpu_info(), "vmem_capacity_bytes", None)
    except Exception:
        cap = None
    if not cap:
        cap = 64 * 1024 * 1024        # conservative (v7x-sized) fallback
    return int(min(cap * 3 // 4, 96 * 1024 * 1024))


VMEM_LIMIT = _derive_vmem_limit()
# Per-kernel resident-tile budget (leaves headroom for double-buffering slack).
_WORKSET_BUDGET = int(VMEM_LIMIT * 0.6)


# -----------------------------------------------------------------------------
# Tile-size helpers
# -----------------------------------------------------------------------------
def _tile_rows(dim, target=256):
    """Row (sublane) tile: multiple of 16 (bf16 packs 2 rows/sublane) or full dim."""
    if dim <= target:
        return dim
    start = target - target % 16
    for t in range(start, 15, -16):
        if dim % t == 0:
            return t
    return dim


def _tile_lanes(dim, target=1024):
    """Lane tile: prefer 256-multiples (full v6e/v7x MXU pass), else 128, else full."""
    if dim <= target:
        return dim
    for t in range(target - target % 256, 255, -256):
        if dim % t == 0:
            return t
    for t in range(target - target % 128, 127, -128):
        if dim % t == 0:
            return t
    return dim


def _attn_seq_tile(seq, target=256):
    if seq <= target:
        return seq
    for t in range(target, 127, -128):
        if seq % t == 0:
            return t
    return seq


# -----------------------------------------------------------------------------
# Linear (+ optional bias / GELU epilogue): whole-K fast path, K-tiled fallback
# -----------------------------------------------------------------------------
def _linear_wholek_kernel(*refs, activation, has_bias):
    if has_bias:
        x_ref, w_ref, b_ref, o_ref = refs
    else:
        x_ref, w_ref, o_ref = refs
        b_ref = None
    y = jnp.dot(x_ref[...], w_ref[...], preferred_element_type=jnp.float32)
    if b_ref is not None:
        y = y + b_ref[...].astype(jnp.float32)
    if activation == "gelu":
        # exact erf-based GELU, matching HF DistilBERT
        # TODO(synk): on v5e consider approximate=True (tanh on EUP) if the
        # ff1 epilogue ever becomes VALU-bound; kept exact for parity.
        y = jax.nn.gelu(y, approximate=False)
    o_ref[...] = y.astype(o_ref.dtype)


def _linear_tiled_kernel(*refs, activation, has_bias):
    if has_bias:
        x_ref, w_ref, b_ref, o_ref, acc_ref = refs
    else:
        x_ref, w_ref, o_ref, acc_ref = refs
        b_ref = None
    k = pl.program_id(2)

    @pl.when(k == 0)
    def _():
        acc_ref[...] = jnp.zeros_like(acc_ref)

    acc_ref[...] += jnp.dot(x_ref[...], w_ref[...],
                            preferred_element_type=jnp.float32)

    @pl.when(k == pl.num_programs(2) - 1)
    def _():
        y = acc_ref[...]
        if b_ref is not None:
            y = y + b_ref[...].astype(jnp.float32)
        if activation == "gelu":
            y = jax.nn.gelu(y, approximate=False)
        o_ref[...] = y.astype(o_ref.dtype)


def linear(x, w, b=None, activation="none", out_dtype=None,
           tm=256, tn=1024, tk=1024):
    """x: (M, K), w: (K, N), b: (1, N) or None -> (M, N)."""
    M, K = x.shape
    _, N = w.shape
    out_dtype = out_dtype or x.dtype
    tm = _tile_rows(M, tm)
    tn = _tile_lanes(N, tn)

    xb = jnp.dtype(x.dtype).itemsize
    wb = jnp.dtype(w.dtype).itemsize
    ob = jnp.dtype(jnp.dtype(out_dtype)).itemsize
    wholek_bytes = 2 * (tm * K * xb + K * tn * wb + tm * tn * ob)
    if b is not None:
        wholek_bytes += 2 * tn * 4

    if wholek_bytes <= _WORKSET_BUDGET:
        # whole-K contraction: no reduction axis, no acc scratch, direct store.
        in_specs = [pl.BlockSpec((tm, K), lambda i, j: (i, 0)),
                    pl.BlockSpec((K, tn), lambda i, j: (0, j))]
        args = [x, w]
        if b is not None:
            in_specs.append(pl.BlockSpec((1, tn), lambda i, j: (0, j)))
            args.append(b)
        return pl.pallas_call(
            functools.partial(_linear_wholek_kernel, activation=activation,
                              has_bias=b is not None),
            out_shape=jax.ShapeDtypeStruct((M, N), out_dtype),
            grid=(M // tm, N // tn),
            in_specs=in_specs,
            out_specs=pl.BlockSpec((tm, tn), lambda i, j: (i, j)),
            compiler_params=pltpu.CompilerParams(
                dimension_semantics=("parallel", "parallel"),
                vmem_limit_bytes=VMEM_LIMIT),
        )(*args)

    # fallback: K-tiled reduction with f32 accumulator
    tk = _tile_lanes(K, tk)
    in_specs = [pl.BlockSpec((tm, tk), lambda i, j, k: (i, k)),
                pl.BlockSpec((tk, tn), lambda i, j, k: (k, j))]
    args = [x, w]
    if b is not None:
        in_specs.append(pl.BlockSpec((1, tn), lambda i, j, k: (0, j)))
        args.append(b)
    return pl.pallas_call(
        functools.partial(_linear_tiled_kernel, activation=activation,
                          has_bias=b is not None),
        out_shape=jax.ShapeDtypeStruct((M, N), out_dtype),
        grid=(M // tm, N // tn, K // tk),
        in_specs=in_specs,
        out_specs=pl.BlockSpec((tm, tn), lambda i, j, k: (i, j)),
        scratch_shapes=[pltpu.VMEM((tm, tn), jnp.float32)],
        compiler_params=pltpu.CompilerParams(
            dimension_semantics=("parallel", "parallel", "arbitrary"),
            vmem_limit_bytes=VMEM_LIMIT),
    )(*args)


# -----------------------------------------------------------------------------
# Fused linear + bias + residual + LayerNorm (out-proj+LN1, ff2+LN2)
# -----------------------------------------------------------------------------
def _linear_ln_wholek_kernel(x_ref, w_ref, b_ref, res_ref, g_ref, beta_ref,
                             o_ref, *, eps):
    y = jnp.dot(x_ref[...], w_ref[...], preferred_element_type=jnp.float32)
    y = y + b_ref[...].astype(jnp.float32) + res_ref[...].astype(jnp.float32)
    mean = jnp.mean(y, axis=-1, keepdims=True)
    var = jnp.mean(jnp.square(y - mean), axis=-1, keepdims=True)
    y = (y - mean) * jax.lax.rsqrt(var + eps)
    y = y * g_ref[...].astype(jnp.float32) + beta_ref[...].astype(jnp.float32)
    o_ref[...] = y.astype(o_ref.dtype)


def _linear_ln_tiled_kernel(x_ref, w_ref, b_ref, res_ref, g_ref, beta_ref,
                            o_ref, acc_ref, *, eps):
    k = pl.program_id(1)

    @pl.when(k == 0)
    def _():
        acc_ref[...] = jnp.zeros_like(acc_ref)

    acc_ref[...] += jnp.dot(x_ref[...], w_ref[...],
                            preferred_element_type=jnp.float32)

    @pl.when(k == pl.num_programs(1) - 1)
    def _():
        y = (acc_ref[...] + b_ref[...].astype(jnp.float32)
             + res_ref[...].astype(jnp.float32))
        mean = jnp.mean(y, axis=-1, keepdims=True)
        var = jnp.mean(jnp.square(y - mean), axis=-1, keepdims=True)
        y = (y - mean) * jax.lax.rsqrt(var + eps)
        y = y * g_ref[...].astype(jnp.float32) + beta_ref[...].astype(jnp.float32)
        o_ref[...] = y.astype(o_ref.dtype)


def linear_ln(x, res, w, b, gamma, beta, eps=LN_EPS, out_dtype=None,
              tm=256, tk=1024):
    """LayerNorm(x @ w + b + res); N (=hidden) kept whole for the row-wise LN."""
    M, K = x.shape
    _, N = w.shape
    out_dtype = out_dtype or x.dtype
    tm = _tile_rows(M, tm)

    xb = jnp.dtype(x.dtype).itemsize
    wb = jnp.dtype(w.dtype).itemsize
    rb = jnp.dtype(res.dtype).itemsize
    ob = jnp.dtype(jnp.dtype(out_dtype)).itemsize
    wholek_bytes = (2 * (tm * K * xb + K * N * wb + tm * N * rb + tm * N * ob)
                    + 6 * N * 4)

    if wholek_bytes <= _WORKSET_BUDGET:
        return pl.pallas_call(
            functools.partial(_linear_ln_wholek_kernel, eps=eps),
            out_shape=jax.ShapeDtypeStruct((M, N), out_dtype),
            grid=(M // tm,),
            in_specs=[
                pl.BlockSpec((tm, K), lambda i: (i, 0)),
                pl.BlockSpec((K, N), lambda i: (0, 0)),
                pl.BlockSpec((1, N), lambda i: (0, 0)),
                pl.BlockSpec((tm, N), lambda i: (i, 0)),
                pl.BlockSpec((1, N), lambda i: (0, 0)),
                pl.BlockSpec((1, N), lambda i: (0, 0)),
            ],
            out_specs=pl.BlockSpec((tm, N), lambda i: (i, 0)),
            compiler_params=pltpu.CompilerParams(
                dimension_semantics=("parallel",),
                vmem_limit_bytes=VMEM_LIMIT),
        )(x, w, b, res, gamma, beta)

    tk = _tile_lanes(K, tk)
    return pl.pallas_call(
        functools.partial(_linear_ln_tiled_kernel, eps=eps),
        out_shape=jax.ShapeDtypeStruct((M, N), out_dtype),
        grid=(M // tm, K // tk),
        in_specs=[
            pl.BlockSpec((tm, tk), lambda i, k: (i, k)),
            pl.BlockSpec((tk, N), lambda i, k: (k, 0)),
            pl.BlockSpec((1, N), lambda i, k: (0, 0)),
            pl.BlockSpec((tm, N), lambda i, k: (i, 0)),
            pl.BlockSpec((1, N), lambda i, k: (0, 0)),
            pl.BlockSpec((1, N), lambda i, k: (0, 0)),
        ],
        out_specs=pl.BlockSpec((tm, N), lambda i, k: (i, 0)),
        scratch_shapes=[pltpu.VMEM((tm, N), jnp.float32)],
        compiler_params=pltpu.CompilerParams(
            dimension_semantics=("parallel", "arbitrary"),
            vmem_limit_bytes=VMEM_LIMIT),
    )(x, w, b, res, gamma, beta)


# -----------------------------------------------------------------------------
# LayerNorm without residual (embedding LN)
# -----------------------------------------------------------------------------
def _layernorm_kernel(x_ref, g_ref, b_ref, o_ref, *, eps):
    x = x_ref[...].astype(jnp.float32)
    mean = jnp.mean(x, axis=-1, keepdims=True)
    var = jnp.mean(jnp.square(x - mean), axis=-1, keepdims=True)
    y = (x - mean) * jax.lax.rsqrt(var + eps)
    y = y * g_ref[...].astype(jnp.float32) + b_ref[...].astype(jnp.float32)
    o_ref[...] = y.astype(o_ref.dtype)


def layernorm(x, gamma, beta, eps=LN_EPS, out_dtype=None, tm=256):
    M, H = x.shape
    out_dtype = out_dtype or x.dtype
    tm = _tile_rows(M, tm)
    return pl.pallas_call(
        functools.partial(_layernorm_kernel, eps=eps),
        out_shape=jax.ShapeDtypeStruct((M, H), out_dtype),
        grid=(M // tm,),
        in_specs=[
            pl.BlockSpec((tm, H), lambda i: (i, 0)),
            pl.BlockSpec((1, H), lambda i: (0, 0)),
            pl.BlockSpec((1, H), lambda i: (0, 0)),
        ],
        out_specs=pl.BlockSpec((tm, H), lambda i: (i, 0)),
        compiler_params=pltpu.CompilerParams(
            dimension_semantics=("parallel",),
            vmem_limit_bytes=VMEM_LIMIT),
    )(x, gamma, beta)


# -----------------------------------------------------------------------------
# Flash-style multi-head self-attention over the fused (B*S, 3H) QKV slab.
# grid = (batch, q-tiles, kv-tiles); online softmax in f32 VMEM scratch;
# 1/sqrt(head_dim) is pre-folded into the Q weight columns.
# -----------------------------------------------------------------------------
def _flash_attn_kernel(q_ref, kv_ref, mask_ref, o_ref, m_sc, l_sc, acc_sc,
                       *, n_heads, head_dim, hidden):
    ki = pl.program_id(2)

    @pl.when(ki == 0)
    def _():
        m_sc[...] = jnp.full_like(m_sc, -jnp.inf)
        l_sc[...] = jnp.zeros_like(l_sc)
        acc_sc[...] = jnp.zeros_like(acc_sc)

    mask = mask_ref[...].astype(jnp.float32)            # (1, tkv) additive key mask

    # Per-head static slices of the QKV slab; each head's (tq, tkv) score tile
    # dies before the next head (no list + concat, no full-S materialization).
    # TODO(synk): head_dim=64 slices stay 64-lane (sub-128) — pairing heads
    # would need a batched QK^T and is not worth the reshape relayouts here.
    for h in range(n_heads):
        sl = slice(h * head_dim, (h + 1) * head_dim)
        qh = q_ref[:, sl]                                           # (tq, dh)
        kh = kv_ref[:, hidden + h * head_dim:hidden + (h + 1) * head_dim]
        vh = kv_ref[:, 2 * hidden + h * head_dim:2 * hidden + (h + 1) * head_dim]
        # contract last dims -> no XLU transpose of K
        s = jax.lax.dot_general(qh, kh, (((1,), (1,)), ((), ())),
                                preferred_element_type=jnp.float32)  # (tq, tkv)
        s = s + mask
        m_prev = m_sc[:, h:h + 1]
        m_new = jnp.maximum(m_prev, jnp.max(s, axis=-1, keepdims=True))
        alpha = jnp.exp(m_prev - m_new)
        p = jnp.exp(s - m_new)
        l_sc[:, h:h + 1] = alpha * l_sc[:, h:h + 1] + jnp.sum(p, axis=-1, keepdims=True)
        acc_sc[:, sl] = alpha * acc_sc[:, sl] + jnp.dot(
            p.astype(vh.dtype), vh, preferred_element_type=jnp.float32)
        m_sc[:, h:h + 1] = m_new

    @pl.when(ki == pl.num_programs(2) - 1)
    def _():
        for h in range(n_heads):
            sl = slice(h * head_dim, (h + 1) * head_dim)
            inv = pl.reciprocal(l_sc[:, h:h + 1])      # exact; once per q tile
            o_ref[:, sl] = (acc_sc[:, sl] * inv).astype(o_ref.dtype)


def attention(qkv, mask_add, *, batch, seq, n_heads, head_dim):
    hidden = n_heads * head_dim
    tq = _attn_seq_tile(seq)
    tkv = _attn_seq_tile(seq)
    nq = seq // tq
    nk = seq // tkv
    return pl.pallas_call(
        functools.partial(_flash_attn_kernel, n_heads=n_heads,
                          head_dim=head_dim, hidden=hidden),
        out_shape=jax.ShapeDtypeStruct((batch * seq, hidden), qkv.dtype),
        grid=(batch, nq, nk),
        in_specs=[
            # Q rows: full 3H lane width (always lane-legal); the block index is
            # constant over ki so this tile is fetched once per (b, qi).
            pl.BlockSpec((tq, 3 * hidden), lambda b, qi, ki: (b * nq + qi, 0)),
            # K/V rows, streamed over ki
            pl.BlockSpec((tkv, 3 * hidden), lambda b, qi, ki: (b * nk + ki, 0)),
            # additive key mask, (B, S) indexed per (batch, kv-tile)
            pl.BlockSpec((1, tkv), lambda b, qi, ki: (b, ki)),
        ],
        out_specs=pl.BlockSpec((tq, hidden), lambda b, qi, ki: (b * nq + qi, 0)),
        scratch_shapes=[
            pltpu.VMEM((tq, n_heads), jnp.float32),    # running max
            pltpu.VMEM((tq, n_heads), jnp.float32),    # running denom
            pltpu.VMEM((tq, hidden), jnp.float32),     # context accumulator
        ],
        compiler_params=pltpu.CompilerParams(
            dimension_semantics=("parallel", "parallel", "arbitrary"),
            vmem_limit_bytes=VMEM_LIMIT),
    )(qkv, qkv, mask_add)


# -----------------------------------------------------------------------------
# Model (distilbert-style backbone + bias-free CLS classifier)
# -----------------------------------------------------------------------------
def init_params(key, *, vocab, max_pos, hidden, n_layers, n_heads, ffn, num_labels):
    def nrm(k, shape, scale=0.02):
        return scale * jax.random.normal(k, shape, jnp.float32)

    head_dim = hidden // n_heads
    q_scale = 1.0 / math.sqrt(head_dim)

    keys = jax.random.split(key, 4 + n_layers)
    params = {
        "word_emb": nrm(keys[0], (vocab, hidden)),
        "pos_emb": nrm(keys[1], (max_pos, hidden)),
        "emb_ln_g": jnp.ones((1, hidden), jnp.float32),
        "emb_ln_b": jnp.zeros((1, hidden), jnp.float32),
        "cls_w": nrm(keys[2], (hidden, num_labels)).astype(COMPUTE_DTYPE),
        "layers": [],
    }
    for li in range(n_layers):
        lk = jax.random.split(keys[4 + li], 6)
        # fused (H, 3H) QKV weight; 1/sqrt(head_dim) folded into the Q columns
        # at parameter-prep time (in f32, before the bf16 cast). A nonzero Q
        # bias would need the same fold (biases are zero here).
        qkv_w = jnp.concatenate(
            [nrm(lk[0], (hidden, hidden)) * q_scale,
             nrm(lk[1], (hidden, hidden)),
             nrm(lk[2], (hidden, hidden))], axis=1).astype(COMPUTE_DTYPE)
        params["layers"].append({
            "qkv_w": qkv_w,
            "qkv_b": jnp.zeros((1, 3 * hidden), jnp.float32),
            "o_w": nrm(lk[3], (hidden, hidden)).astype(COMPUTE_DTYPE),
            "o_b": jnp.zeros((1, hidden), jnp.float32),
            "ff1_w": nrm(lk[4], (hidden, ffn)).astype(COMPUTE_DTYPE),
            "ff1_b": jnp.zeros((1, ffn), jnp.float32),
            "ff2_w": nrm(lk[5], (ffn, hidden)).astype(COMPUTE_DTYPE),
            "ff2_b": jnp.zeros((1, hidden), jnp.float32),
            "ln1_g": jnp.ones((1, hidden), jnp.float32),
            "ln1_b": jnp.zeros((1, hidden), jnp.float32),
            "ln2_g": jnp.ones((1, hidden), jnp.float32),
            "ln2_b": jnp.zeros((1, hidden), jnp.float32),
        })
    return params


def forward(params, input_ids, attention_mask, *, n_heads, remove_layers):
    B, S = input_ids.shape
    H = params["word_emb"].shape[1]
    dh = H // n_heads
    n_layers = len(params["layers"])

    # Embeddings (gather is XLA glue); embedding LayerNorm runs in-kernel.
    x = params["word_emb"][input_ids] + params["pos_emb"][jnp.arange(S)][None, :, :]
    x = x.reshape(B * S, H)
    x = layernorm(x, params["emb_ln_g"], params["emb_ln_b"], out_dtype=COMPUTE_DTYPE)

    # Additive key mask kept as (B, S); indexed per (batch, kv-tile) in-kernel.
    if attention_mask is None:
        attention_mask = jnp.ones((B, S), jnp.float32)
    neg = jnp.finfo(jnp.float32).min
    mask_add = (1.0 - attention_mask.astype(jnp.float32)) * neg

    ones_g = jnp.ones((1, H), jnp.float32)
    zeros_b = jnp.zeros((1, H), jnp.float32)

    for li, p in enumerate(params["layers"]):
        affine = li not in remove_layers   # removed layers -> affine-free LayerNorm
        ln1_g, ln1_b = (p["ln1_g"], p["ln1_b"]) if affine else (ones_g, zeros_b)
        ln2_g, ln2_b = (p["ln2_g"], p["ln2_b"]) if affine else (ones_g, zeros_b)

        # fused QKV projection: one pass over x
        qkv = linear(x, p["qkv_w"], p["qkv_b"])                      # (B*S, 3H)
        ctx = attention(qkv, mask_add, batch=B, seq=S,
                        n_heads=n_heads, head_dim=dh)                # (B*S, H)
        # out-projection + residual + LayerNorm fused in one kernel
        x = linear_ln(ctx, x, p["o_w"], p["o_b"], ln1_g, ln1_b)

        if li == n_layers - 1:
            # Only the CLS token feeds the classifier and the FFN is per-token,
            # so the last layer's FFN runs on the CLS rows only (same logits).
            x = x.reshape(B, S, H)[:, 0, :]                          # (B, H)

        # FFN: lin1 + GELU, then lin2 + residual + LayerNorm fused
        h = linear(x, p["ff1_w"], p["ff1_b"], activation="gelu")
        x = linear_ln(h, x, p["ff2_w"], p["ff2_b"], ln2_g, ln2_b)

    # bias-free classifier on the CLS rows: tiny (B, num_labels) matmul -> XLA
    logits = jnp.dot(x, params["cls_w"], preferred_element_type=jnp.float32)
    return logits


# -----------------------------------------------------------------------------
# Main
# -----------------------------------------------------------------------------
if __name__ == "__main__":
    B, S = 2, 8
    VOCAB, MAX_POS = 100, 32
    HIDDEN, N_HEADS, FFN = 32, 2, 64
    N_LAYERS = 2
    NUM_LABELS = 4
    REMOVE_LAYERS = (1,)   # these layers' LayerNorms lose weight/bias (no affine)

    key = jax.random.PRNGKey(0)
    kp, kx = jax.random.split(key)
    params = init_params(kp, vocab=VOCAB, max_pos=MAX_POS, hidden=HIDDEN,
                         n_layers=N_LAYERS, n_heads=N_HEADS, ffn=FFN,
                         num_labels=NUM_LABELS)

    input_ids = jax.random.randint(kx, (B, S), 0, VOCAB, dtype=jnp.int32)
    attention_mask = jnp.ones((B, S), jnp.float32)

    logits = forward(params, input_ids, attention_mask,
                     n_heads=N_HEADS, remove_layers=REMOVE_LAYERS)
    logits = jax.block_until_ready(logits)
    assert logits.shape == (B, NUM_LABELS)
    print("KERNEL_OK")
</pallas_src>

<mosaic_0001>
module attributes {stable_mosaic.version = 11 : i64} {
  func.func @_layernorm_kernel(%arg0: i32, %arg1: memref<16x32xf32, #tpu.memory_space<vmem>>, %arg2: memref<1x32xf32, #tpu.memory_space<vmem>>, %arg3: memref<1x32xf32, #tpu.memory_space<vmem>>, %arg4: memref<16x32xbf16, #tpu.memory_space<vmem>>) attributes {dimension_semantics = [#tpu.dimension_semantics<parallel>], iteration_bounds = array<i64: 1>, scalar_prefetch = 0 : i64, scratch_operands = 0 : i64, tpu.core_type = #tpu.core_type<tc>, window_params = [{transform_indices = @transform_0, window_bounds = array<i64: 16, 32>}, {pipeline_mode = #tpu.pipeline_mode<synchronous>, transform_indices = @transform_1, window_bounds = array<i64: 1, 32>}, {pipeline_mode = #tpu.pipeline_mode<synchronous>, transform_indices = @transform_2, window_bounds = array<i64: 1, 32>}, {transform_indices = @transform_3, window_bounds = array<i64: 16, 32>}]} {
    %c0 = arith.constant 0 : index
    %c0_0 = arith.constant 0 : index
    %0 = vector.load %arg1[%c0, %c0_0] : memref<16x32xf32, #tpu.memory_space<vmem>>, vector<16x32xf32>
    %cst = arith.constant dense<0.000000e+00> : vector<16xf32>
    %1 = vector.multi_reduction <add>, %0, %cst [1] : vector<16x32xf32> to vector<16xf32>
    %2 = vector.shape_cast %1 : vector<16xf32> to vector<16x1xf32>
    %cst_1 = arith.constant 3.200000e+01 : f32
    %3 = vector.broadcast %cst_1 : f32 to vector<16x1xf32>
    %4 = arith.divf %2, %3 : vector<16x1xf32>
    %5 = vector.broadcast %4 : vector<16x1xf32> to vector<16x32xf32>
    %6 = arith.subf %0, %5 : vector<16x32xf32>
    %7 = arith.mulf %6, %6 : vector<16x32xf32>
    %cst_2 = arith.constant dense<0.000000e+00> : vector<16xf32>
    %8 = vector.multi_reduction <add>, %7, %cst_2 [1] : vector<16x32xf32> to vector<16xf32>
    %9 = vector.shape_cast %8 : vector<16xf32> to vector<16x1xf32>
    %cst_3 = arith.constant 3.200000e+01 : f32
    %10 = vector.broadcast %cst_3 : f32 to vector<16x1xf32>
    %11 = arith.divf %9, %10 : vector<16x1xf32>
    %12 = vector.broadcast %4 : vector<16x1xf32> to vector<16x32xf32>
    %13 = arith.subf %0, %12 : vector<16x32xf32>
    %cst_4 = arith.constant 9.99999996E-13 : f32
    %14 = vector.broadcast %cst_4 : f32 to vector<16x1xf32>
    %15 = arith.addf %11, %14 : vector<16x1xf32>
    %16 = math.rsqrt %15 : vector<16x1xf32>
    %17 = vector.broadcast %16 : vector<16x1xf32> to vector<16x32xf32>
    %18 = arith.mulf %13, %17 : vector<16x32xf32>
    %c0_5 = arith.constant 0 : index
    %c0_6 = arith.constant 0 : index
    %19 = vector.load %arg2[%c0_5, %c0_6] : memref<1x32xf32, #tpu.memory_space<vmem>>, vector<1x32xf32>
    %20 = vector.broadcast %19 : vector<1x32xf32> to vector<16x32xf32>
    %21 = arith.mulf %18, %20 : vector<16x32xf32>
    %c0_7 = arith.constant 0 : index
    %c0_8 = arith.constant 0 : index
    %22 = vector.load %arg3[%c0_7, %c0_8] : memref<1x32xf32, #tpu.memory_space<vmem>>, vector<1x32xf32>
    %23 = vector.broadcast %22 : vector<1x32xf32> to vector<16x32xf32>
    %24 = arith.addf %21, %23 : vector<16x32xf32>
    %25 = arith.truncf %24 : vector<16x32xf32> to vector<16x32xbf16>
    %c0_9 = arith.constant 0 : index
    %c0_10 = arith.constant 0 : index
    %26 = vector.load %arg4[%c0_9, %c0_10] : memref<16x32xbf16, #tpu.memory_space<vmem>>, vector<16x32xbf16>
    tpu.vector_store %arg4[%c0_9, %c0_10], %25 {strides = array<i32>} : memref<16x32xbf16, #tpu.memory_space<vmem>>, vector<16x32xbf16>,
    return
  }
  func.func @transform_0(%arg0: i32) -> (i32, i32) {
    %c0_i32 = arith.constant 0 : i32
    %c0_i32_0 = arith.constant 0 : i32
    return %arg0, %c0_i32 : i32, i32
  }
  func.func @transform_1(%arg0: i32) -> (i32, i32) {
    %c0_i32 = arith.constant 0 : i32
    %c0_i32_0 = arith.constant 0 : i32
    %c0_i32_1 = arith.constant 0 : i32
    return %c0_i32, %c0_i32_0 : i32, i32
  }
  func.func @transform_2(%arg0: i32) -> (i32, i32) {
    %c0_i32 = arith.constant 0 : i32
    %c0_i32_0 = arith.constant 0 : i32
    %c0_i32_1 = arith.constant 0 : i32
    return %c0_i32, %c0_i32_0 : i32, i32
  }
  func.func @transform_3(%arg0: i32) -> (i32, i32) {
    %c0_i32 = arith.constant 0 : i32
    %c0_i32_0 = arith.constant 0 : i32
    return %arg0, %c0_i32 : i32, i32
  }
}

</mosaic_0001>

<bundles_post_ra>
// kernel: tpu_custom_call.1
= control target key start
LH: loop header
LB: loop body
LE: loop exit
PB: predicated region body
PF: predicated region fallthrough
CT: control target
= control target key end

     0   :  { %8 = vsyncpa [#allocation3], 0  ;;  %s229_s0 = inlined_call_operand.hbm [shape: f32[16,32], index: 0, kind: input, shape index: {}]   ;;  %s230_s1 = inlined_call_operand.vmem [shape: f32[1,32], index: 1, kind: input, shape index: {}]   ;;  %s231_s2 = inlined_call_operand.vmem [shape: f32[1,32], index: 2, kind: input, shape index: {}]   ;;  %s232_s3 = inlined_call_operand.hbm [shape: bf16[16,32], index: 3, kind: output, shape index: {}]  }
   0x1   :  { %9 = vsyncpa [#allocation4], 0  ;;  %s169_s12 = smov [#allocation2]   ;;  %s121_s16 = scalar_lea.hbm %s229_s0, 256 }
   0x2   :  { %s15_s13 = sshll.u32 %s169_s12, 4  ;;  %p122_p0 = scmp.ne.s32.totalorder %s229_s0, %s121_s16  ;;  %s16_s13 = int_to_ptr.vmem [resolvable:$true] %s15_s13 }
   0x3   :  { %p125_p1 = scmp.lt.u32.totalorder %s121_s16, %s229_s0 }
   0x5   :  { %p127_p2 = pnand %p125_p1, %p122_p0 }
   0x7   :  { %130 = shalt.err (!%p127_p2)
}
   0x8   :  { %s131_s21 = scalar_lea.vmem %s16_s13, 256  ;;  %p136_p4 = scmp.lt.s32.totalorder %s16_s13, %s16_s13 }
   0x9   :  { %p132_p3 = scmp.ne.s32.totalorder %s16_s13, %s131_s21  ;;  %p137_p5 = scmp.lt.s32.totalorder %s131_s21, %s131_s21 }
   0xb   :  { %p138_p6 = por %p137_p5, %p136_p4 }
   0xd   :  { %p139_p7 = pnand %p138_p6, %p132_p3 }
   0xf   :  { %142 = shalt.err (!%p139_p7)
}
  0x10   :  { %s170_s22 = smov 128   ;;  %s171_s23 = smov 8  }
  0x11   :  { %21 = dma.hbm_to_vmem [thread:$0]  %s229_s0, 256, %s16_s13, [#allocation3], %s170_s22, %s170_s22, %s171_s23  }
  0x12   :  { %165 = dma.done.wait [#allocation3], 256  }
  0x13   :  { %166 = vsyncadd [#allocation3], 4294967040  ;;  %vm31_vm0 = vcmask 261120   ;;  %v29_v0 = vld [vmem:[#allocation2] sm:$0xff]  ;;  %v30_v1 = vld [vmem:[#allocation2 + $0x8] sm:$0xff]  ;;  %vm85_vm1 = vcmask 257024  }
  0x14   :  { %v32_v2 = vsel %vm31_vm0, %v29_v0, 0.0  ;;  %v35_v3 = vsel %vm31_vm0, %v30_v1, 0.0  ;;  %v105_v21 = vld [vmem:[%s230_s1] ss:$0 sm:$0xff]  ;;  %s172_s29 = smov [#allocation5]  }
  0x15   :  { %33 = vadd.xlane.f32.xlu0 %v32_v2  ;;  %v106_v23 = vld [vmem:[%s231_s2] ss:$0 sm:$0xff]  ;;  %s93_s30 = sshll.u32 %s172_s29, 4  ;;  %s94_s30 = int_to_ptr.vmem [resolvable:$true] %s93_s30 }
  0x16   :  { %s143_s1 = scalar_lea.vmem %s94_s30, 128  ;;  %p148_p9 = scmp.lt.s32.totalorder %s94_s30, %s94_s30 }
  0x17   :  { %p144_p8 = scmp.ne.s32.totalorder %s94_s30, %s143_s1  ;;  %p149_p10 = scmp.lt.s32.totalorder %s143_s1, %s143_s1 }
  0x19   :  { %36 = vadd.xlane.f32.xlu0 %v35_v3  ;;  %p150_p11 = por %p149_p10, %p148_p9 }
  0x1b   :  { %p151_p12 = pnand %p150_p11, %p144_p8 }
  0xa2   :  { %v34_v4 = vpop.xlane.xlu0 %33 }
  0xa3   :  { %v39_v5 = vmul.f32 0.03125, %v34_v4 }
  0xa5   :  { %v41_v6 = vsub.f32 %v29_v0, %v39_v5 }
  0xa6   :  { %v37_v7 = vpop.xlane.xlu0 %36 }
  0xa7   :  { %v40_v8 = vmul.f32 0.03125, %v37_v7  ;;  %v43_v9 = vmul.f32 %v41_v6, %v41_v6 }
  0xa9   :  { %v42_v10 = vsub.f32 %v30_v1, %v40_v8  ;;  %v45_v11 = vsel %vm31_vm0, %v43_v9, 0.0 }
  0xaa   :  { %46 = vadd.xlane.f32.xlu1 %v45_v11 }
  0xab   :  { %v44_v12 = vmul.f32 %v42_v10, %v42_v10 }
  0xad   :  { %v48_v13 = vsel %vm31_vm0, %v44_v12, 0.0 }
  0xae   :  { %49 = vadd.xlane.f32.xlu1 %v48_v13 }
 0x137   :  { %v47_v14 = vpop.xlane.xlu1 %46 }
 0x138   :  { %v51_v15 = vmul.f32 0.03125, %v47_v14 }
 0x13a   :  { %v53_v16 = vadd.f32 1e-12, %v51_v15 }
 0x13b   :  { %v50_v17 = vpop.xlane.xlu1 %49 }
 0x13c   :  { %117 = vrsqrt.f32 %v53_v16  ;;  %v52_v18 = vmul.f32 0.03125, %v50_v17 }
 0x13e   :  { %v54_v19 = vadd.f32 1e-12, %v52_v18 }
 0x140   :  { %119 = vrsqrt.f32 %v54_v19 }
 0x146   :  { %v118_v20 = vpop.eup %117 }
 0x147   :  { %v57_v22 = vmul.f32 %v118_v20, %v41_v6 }
 0x149   :  { %v66_v24 = vmul.f32 %v105_v21, %v57_v22 }
 0x14a   :  { %v120_v25 = vpop.eup %119 }
 0x14b   :  { %v58_v26 = vmul.f32 %v120_v25, %v42_v10  ;;  %v75_v27 = vadd.f32 %v106_v23, %v66_v24 }
 0x14d   :  { %v67_v28 = vmul.f32 %v105_v21, %v58_v26  ;;  %v109_v29 = vpack.c.bf16 %v75_v27, %v75_v27 }
 0x14f   :  { %v76_v30 = vadd.f32 %v106_v23, %v67_v28  ;;  %86 = vst.msk [vmem:[#allocation5] sm:$0xf] %vm85_vm1, %v109_v29 }
 0x151   :  { %v110_v31 = vpack.c.bf16 %v76_v30, %v76_v30 }
 0x153   :  { %87 = vst.msk [vmem:[#allocation5 + $0x4] sm:$0xf] %vm85_vm1, %v110_v31 }
 0x154   :  { %154 = shalt.err (!%p151_p12)
}
 0x155   :  { %s155_s5 = scalar_lea.hbm %s232_s3, 128 }
 0x156   :  { %p156_p13 = scmp.ne.s32.totalorder %s232_s3, %s155_s5  ;;  %p159_p0 = scmp.lt.u32.totalorder %s155_s5, %s232_s3 }
 0x158   :  { %p161_p1 = pnand %p159_p0, %p156_p13 }
 0x15a   :  { %164 = shalt.err (!%p161_p1)
}
 0x15b   :  { %s173_s10 = smov 64   ;;  %s174_s11 = smov 4  }
 0x15c   :  { %99 = dma.vmem_to_hbm [thread:$0]  %s94_s30, 128, %s232_s3, [#allocation4], %s173_s10, %s173_s10, %s174_s11  }
 0x15d   :  { %167 = dma.done.wait [#allocation4], 128  }
 0x15e   :  { %168 = vsyncadd [#allocation4], 4294967168 }
 0x15f   :  { %103 = vsyncpa [#allocation3], 1 }
 0x160   :  { %104 = vsyncpa [#allocation4], 1 }

</bundles_post_ra>
